<compile_context>
chip_gen: v7x
topology: tpu7x:2x2x1
jax: 0.10.0
libtpu: 0.0.40
codegen_flags: <defaults>
</compile_context>

<pallas_src>
import functools

import jax
import jax.numpy as jnp
from jax import lax
from jax.experimental import pallas as pl
from jax.experimental.pallas import tpu as pltpu

TEMPERATURE = 0.5
# torch.nn.CosineSimilarity default eps.  NOTE: torch clamps the *product* of
# norms; we clamp each row norm.  Identical unless an embedding has norm < 1e-8.
COS_EPS = 1e-8
NEG_BIG = -1e30          # masked-entry sentinel; exp() underflows to exactly 0.
_LANE = 128
_TILE_VMEM_BUDGET = 12 * 1024 * 1024  # bytes for double-buffered I/O tiles


def _round_up(x, m):
    return ((x + m - 1) // m) * m


def _pick_tile(n_pad, cap):
    """Largest multiple of 128 that divides n_pad and is <= cap (n_pad % 128 == 0)."""
    cap = max(_LANE, min(cap, n_pad))
    best = _LANE
    t = _LANE
    while t <= cap:
        if n_pad % t == 0:
            best = t
        t += _LANE
    return best


def _pick_stage1_tile(bh, cap):
    """Largest multiple of 64 that divides bh and is <= cap (bh % 64 == 0)."""
    cap = max(64, min(cap, bh))
    best = 64
    t = 64
    while t <= cap:
        if bh % t == 0:
            best = t
        t += 64
    return best


# -----------------------------------------------------------------------------
# Stage 1: normalize + temperature fold + positive logits  (O(N*D), tiled)
# -----------------------------------------------------------------------------
def _prep_kernel(zi_ref, zj_ref, zn_ref, pos_ref, *, inv_sqrt_temp):
    zi = zi_ref[...].astype(jnp.float32)          # (tb, D)
    zj = zj_ref[...].astype(jnp.float32)          # (tb, D)

    def _normalize(x):
        ss = jnp.sum(x * x, axis=-1, keepdims=True)
        inv = lax.rsqrt(jnp.maximum(ss, COS_EPS * COS_EPS))   # EUP rsqrt, ~free slot
        return x * (inv * inv_sqrt_temp)          # fold 1/sqrt(T) into each row

    a = _normalize(zi)                            # zero pad rows stay exactly zero
    c = _normalize(zj)

    # bf16 rows feed the MXU in Stage 2; all softmax math stays f32.
    zn_ref[0, :, :] = a.astype(jnp.bfloat16)
    zn_ref[1, :, :] = c.astype(jnp.bfloat16)

    # cos(z_i, z_j) / temperature (both factors carry 1/sqrt(T)), kept in f32.
    p = jnp.sum(a * c, axis=-1, keepdims=True)    # (tb, 1)
    pos_ref[0, :, :] = p
    pos_ref[1, :, :] = p


# -----------------------------------------------------------------------------
# Stage 2: tiled bf16 similarity + fixed-max logsumexp  (O(N^2*D))
# -----------------------------------------------------------------------------
def _ntxent_tile_kernel(zn_row_ref, zn_col_ref, pos_ref, o_ref, l_sc, *,
                        max_logit, b_half, b_real):
    i = pl.program_id(0)
    k = pl.program_id(1)
    nk = pl.num_programs(1)
    bm = zn_row_ref.shape[0]
    bn = zn_col_ref.shape[0]

    @pl.when(k == 0)
    def _():
        l_sc[...] = jnp.zeros_like(l_sc)

    a = zn_row_ref[...]            # (bm, D) bf16, rows already scaled by 1/sqrt(T)
    b = zn_col_ref[...]            # (bn, D) bf16
    # sim / T for this tile.  NT contraction (dim 1 of both operands) is the
    # standard flash-attention q@k.T feed; bf16 inputs, f32 accumulation.
    # TODO(synk): per perf review, verify via pl.lower_as_mlir that no per-tile
    #             vxpose is inserted; if it is, emit a (D, N) transposed zn.
    s = lax.dot_general(a, b, (((1,), (1,)), ((), ())),
                        preferred_element_type=jnp.float32)    # (bm, bn) f32

    # Mask the global diagonal (self-similarity) and any padded columns.
    row = lax.broadcasted_iota(jnp.int32, (bm, bn), 0) + i * bm
    col = lax.broadcasted_iota(jnp.int32, (bm, bn), 1) + k * bn
    invalid = col == row
    if b_real < b_half:            # only emit the pad-column mask when padding exists
        col_in_half = jnp.where(col >= b_half, col - b_half, col)
        invalid = invalid | (col_in_half >= b_real)
    s = jnp.where(invalid, NEG_BIG, s)

    # Fixed-max logsumexp: logits are bounded by 1/T, so exp(s - M) is in (0, 1].
    # No XLU row-max, no rescale, no cross-k dependency on a running max.
    e = jnp.exp(s - max_logit)

    # Lane-partial accumulation: static 128-aligned lane slices on the VALU;
    # the single cross-lane reduce happens only at finalize.
    acc = l_sc[...]
    for g in range(bn // _LANE):
        acc = acc + e[:, g * _LANE:(g + 1) * _LANE]
    l_sc[...] = acc

    @pl.when(k == nk - 1)
    def _():
        p = pos_ref[...]                              # (bm, 1) f32
        # torch logits = [pos, all off-diagonal]; the positive pair is also one
        # of the off-diagonal entries, so it is counted twice.
        l_tot = jnp.sum(l_sc[...], axis=-1, keepdims=True) + jnp.exp(p - max_logit)
        o_ref[...] = (max_logit + jnp.log(l_tot)) - p


def ntxent_loss(z_i, z_j, temperature=TEMPERATURE, block_m=512, block_n=512):
    """NT-Xent loss matching the torch module. z_i, z_j: (B, D) -> scalar f32."""
    # TODO(synk): p_drop_negative_samples (torch.randint-based negative
    #             dropping) not implemented — module default is None.
    # TODO(synk): for extremely large D (> ~32K) add a D-chunk accumulation loop
    #             in Stage 2; current tiles load full-D rows.
    if z_i.shape != z_j.shape:
        raise ValueError("z_i and z_j must have the same shape")
    bsz, d = z_i.shape
    n = 2 * bsz
    n_pad = _round_up(n, _LANE)        # pad to 128-multiple; no full-N fallback tile
    bh = n_pad // 2                    # padded half size (multiple of 64)
    inv_sqrt_temp = float(temperature) ** -0.5
    max_logit = 1.0 / float(temperature)

    # Zero-pad each half; zero rows normalize to zero and are masked in Stage 2.
    if bh > bsz:
        pad = ((0, bh - bsz), (0, 0))
        z_i_p = jnp.pad(z_i, pad)
        z_j_p = jnp.pad(z_j, pad)
    else:
        z_i_p, z_j_p = z_i, z_j

    # ---- Stage 1: normalized + temperature-folded bf16 rows, f32 positives ---
    tb_cap = max(64, _TILE_VMEM_BUDGET // (24 * d))   # 2 f32 ins + bf16 out, 2 bufs
    tb = _pick_stage1_tile(bh, min(512, tb_cap))
    zn3, pos3 = pl.pallas_call(
        functools.partial(_prep_kernel, inv_sqrt_temp=inv_sqrt_temp),
        out_shape=(jax.ShapeDtypeStruct((2, bh, d), jnp.bfloat16),
                   jax.ShapeDtypeStruct((2, bh, 1), jnp.float32)),
        grid=(bh // tb,),
        in_specs=[pl.BlockSpec((tb, d), lambda i: (i, 0)),
                  pl.BlockSpec((tb, d), lambda i: (i, 0))],
        out_specs=(pl.BlockSpec((2, tb, d), lambda i: (0, i, 0)),
                   pl.BlockSpec((2, tb, 1), lambda i: (0, i, 0))),
        compiler_params=pltpu.CompilerParams(
            dimension_semantics=("parallel",)),
    )(z_i_p, z_j_p)

    zn = zn3.reshape(n_pad, d)       # merges leading dims; layout-preserving
    pos = pos3.reshape(n_pad, 1)

    # ---- Stage 2: tiled bf16 sim + fixed-max online denominator -------------
    # D-aware VMEM budget for the double-buffered bf16 row+col tiles, and cap
    # bm so the "parallel" row axis has >= 2 tiles (v7x: 2 TensorCores).
    tile_cap_d = max(_LANE, _TILE_VMEM_BUDGET // (8 * d))
    bm_cap = min(block_m, tile_cap_d)
    bn_cap = min(block_n, tile_cap_d)
    if n_pad >= 2 * _LANE:
        bm_cap = min(bm_cap, n_pad // 2)
    bm = _pick_tile(n_pad, bm_cap)
    bn = _pick_tile(n_pad, bn_cap)
    grid = (n_pad // bm, n_pad // bn)

    per_row = pl.pallas_call(
        functools.partial(_ntxent_tile_kernel, max_logit=max_logit,
                          b_half=bh, b_real=bsz),
        out_shape=jax.ShapeDtypeStruct((n_pad, 1), jnp.float32),
        grid=grid,
        in_specs=[pl.BlockSpec((bm, d), lambda i, k: (i, 0)),   # zn row tile
                  pl.BlockSpec((bn, d), lambda i, k: (k, 0)),   # zn col tile
                  pl.BlockSpec((bm, 1), lambda i, k: (i, 0))],  # pos row tile
        out_specs=pl.BlockSpec((bm, 1), lambda i, k: (i, 0)),
        scratch_shapes=[pltpu.VMEM((bm, _LANE), jnp.float32)],  # lane-partial sums
        compiler_params=pltpu.CompilerParams(
            dimension_semantics=("parallel", "arbitrary"),
            vmem_limit_bytes=32 * 1024 * 1024),
    )(zn, zn, pos)

    # Tiny O(N) reduce in XLA; padded rows (index >= bsz within each half) are
    # excluded from the mean.  Keeps row tiles megacore-safe.
    per_half = per_row.reshape(2, bh)
    return jnp.sum(per_half[:, :bsz]) / n


def _ntxent_ref(z_i, z_j, temperature=TEMPERATURE):
    """Pure-JAX f32 reference mirroring the torch module (positive counted twice)."""
    z = jnp.concatenate([z_i, z_j], axis=0).astype(jnp.float32)
    n = z.shape[0]
    bsz = n // 2
    norm = jnp.maximum(jnp.linalg.norm(z, axis=-1, keepdims=True), COS_EPS)
    zn = z / norm
    sim = (zn @ zn.T) / temperature
    pos = jnp.concatenate(
        [jnp.diagonal(sim, offset=bsz), jnp.diagonal(sim, offset=-bsz)])[:, None]
    masked = jnp.where(jnp.eye(n, dtype=bool), -jnp.inf, sim)
    logits = jnp.concatenate([pos, masked], axis=1)        # (n, n + 1)
    lse = jax.scipy.special.logsumexp(logits, axis=-1)
    return jnp.mean(lse - pos[:, 0])


if __name__ == "__main__":
    key = jax.random.PRNGKey(0)

    # Small case: n = 16 padded to 128, grid (1, 1), single lane group.
    B, D = 8, 32
    k1, k2 = jax.random.split(key)
    z_i = jax.random.normal(k1, (B, D), dtype=jnp.float32)
    z_j = jax.random.normal(k2, (B, D), dtype=jnp.float32)
    loss = jax.block_until_ready(ntxent_loss(z_i, z_j))
    ref = jax.block_until_ready(_ntxent_ref(z_i, z_j))
    assert jnp.isfinite(loss), "kernel produced non-finite loss"
    # bf16 MXU path: ~3 significant digits on logits -> loosened tolerance.
    assert abs(float(loss) - float(ref)) < 5e-2, (float(loss), float(ref))

    # Larger case exercising row/col tiling, the fixed-max accumulation across
    # multiple column tiles, multiple 128-lane groups, and row/column padding:
    # n = 400 padded to 512, bm = 128, bn = 256 -> grid (4, 2).
    B2, D2 = 200, 96
    k3, k4 = jax.random.split(k2)
    z_i2 = jax.random.normal(k3, (B2, D2), dtype=jnp.float32)
    z_j2 = jax.random.normal(k4, (B2, D2), dtype=jnp.float32)
    loss2 = jax.block_until_ready(ntxent_loss(z_i2, z_j2, block_m=128, block_n=256))
    ref2 = jax.block_until_ready(_ntxent_ref(z_i2, z_j2))
    assert jnp.isfinite(loss2), "kernel produced non-finite loss (tiled case)"
    assert abs(float(loss2) - float(ref2)) < 5e-2, (float(loss2), float(ref2))

    print("KERNEL_OK")
</pallas_src>

<mosaic_0001>
module attributes {stable_mosaic.version = 11 : i64} {
  func.func @_prep_kernel(%arg0: i32, %arg1: memref<64x32xf32, #tpu.memory_space<vmem>>, %arg2: memref<64x32xf32, #tpu.memory_space<vmem>>, %arg3: memref<2x64x32xbf16, #tpu.memory_space<vmem>>, %arg4: memref<2x64x1xf32, #tpu.memory_space<vmem>>) attributes {dimension_semantics = [#tpu.dimension_semantics<parallel>], iteration_bounds = array<i64: 1>, scalar_prefetch = 0 : i64, scratch_operands = 0 : i64, tpu.core_type = #tpu.core_type<tc>, window_params = [{transform_indices = @transform_0, window_bounds = array<i64: 64, 32>}, {transform_indices = @transform_1, window_bounds = array<i64: 64, 32>}, {transform_indices = @transform_2, window_bounds = array<i64: 2, 64, 32>}, {transform_indices = @transform_3, window_bounds = array<i64: 2, 64, 1>}]} {
    %c0 = arith.constant 0 : index
    %c0_0 = arith.constant 0 : index
    %0 = vector.load %arg1[%c0, %c0_0] : memref<64x32xf32, #tpu.memory_space<vmem>>, vector<64x32xf32>
    %c0_1 = arith.constant 0 : index
    %c0_2 = arith.constant 0 : index
    %1 = vector.load %arg2[%c0_1, %c0_2] : memref<64x32xf32, #tpu.memory_space<vmem>>, vector<64x32xf32>
    %2 = arith.mulf %0, %0 : vector<64x32xf32>
    %cst = arith.constant dense<0.000000e+00> : vector<64xf32>
    %3 = vector.multi_reduction <add>, %2, %cst [1] : vector<64x32xf32> to vector<64xf32>
    %4 = vector.shape_cast %3 : vector<64xf32> to vector<64x1xf32>
    %cst_3 = arith.constant 1.000000e-16 : f32
    %5 = vector.broadcast %cst_3 : f32 to vector<64x1xf32>
    %6 = arith.maximumf %4, %5 : vector<64x1xf32>
    %7 = math.rsqrt %6 : vector<64x1xf32>
    %cst_4 = arith.constant 1.41421354 : f32
    %8 = vector.broadcast %cst_4 : f32 to vector<64x1xf32>
    %9 = arith.mulf %7, %8 : vector<64x1xf32>
    %10 = vector.broadcast %9 : vector<64x1xf32> to vector<64x32xf32>
    %11 = arith.mulf %0, %10 : vector<64x32xf32>
    %12 = arith.mulf %1, %1 : vector<64x32xf32>
    %cst_5 = arith.constant dense<0.000000e+00> : vector<64xf32>
    %13 = vector.multi_reduction <add>, %12, %cst_5 [1] : vector<64x32xf32> to vector<64xf32>
    %14 = vector.shape_cast %13 : vector<64xf32> to vector<64x1xf32>
    %cst_6 = arith.constant 1.000000e-16 : f32
    %15 = vector.broadcast %cst_6 : f32 to vector<64x1xf32>
    %16 = arith.maximumf %14, %15 : vector<64x1xf32>
    %17 = math.rsqrt %16 : vector<64x1xf32>
    %cst_7 = arith.constant 1.41421354 : f32
    %18 = vector.broadcast %cst_7 : f32 to vector<64x1xf32>
    %19 = arith.mulf %17, %18 : vector<64x1xf32>
    %20 = vector.broadcast %19 : vector<64x1xf32> to vector<64x32xf32>
    %21 = arith.mulf %1, %20 : vector<64x32xf32>
    %22 = arith.truncf %11 : vector<64x32xf32> to vector<64x32xbf16>
    %c0_8 = arith.constant 0 : index
    %c0_9 = arith.constant 0 : index
    %c0_10 = arith.constant 0 : index
    %23 = vector.load %arg3[%c0_8, %c0_9, %c0_10] : memref<2x64x32xbf16, #tpu.memory_space<vmem>>, vector<1x64x32xbf16>
    %24 = vector.shape_cast %23 : vector<1x64x32xbf16> to vector<64x32xbf16>
    %25 = vector.shape_cast %22 : vector<64x32xbf16> to vector<1x64x32xbf16>
    tpu.vector_store %arg3[%c0_8, %c0_9, %c0_10], %25 {strides = array<i32>} : memref<2x64x32xbf16, #tpu.memory_space<vmem>>, vector<1x64x32xbf16>,
    %26 = arith.truncf %21 : vector<64x32xf32> to vector<64x32xbf16>
    %c1 = arith.constant 1 : index
    %c0_11 = arith.constant 0 : index
    %c0_12 = arith.constant 0 : index
    %27 = vector.load %arg3[%c1, %c0_11, %c0_12] : memref<2x64x32xbf16, #tpu.memory_space<vmem>>, vector<1x64x32xbf16>
    %28 = vector.shape_cast %27 : vector<1x64x32xbf16> to vector<64x32xbf16>
    %29 = vector.shape_cast %26 : vector<64x32xbf16> to vector<1x64x32xbf16>
    tpu.vector_store %arg3[%c1, %c0_11, %c0_12], %29 {strides = array<i32>} : memref<2x64x32xbf16, #tpu.memory_space<vmem>>, vector<1x64x32xbf16>,
    %30 = arith.mulf %11, %21 : vector<64x32xf32>
    %cst_13 = arith.constant dense<0.000000e+00> : vector<64xf32>
    %31 = vector.multi_reduction <add>, %30, %cst_13 [1] : vector<64x32xf32> to vector<64xf32>
    %32 = vector.shape_cast %31 : vector<64xf32> to vector<64x1xf32>
    %c0_14 = arith.constant 0 : index
    %c0_15 = arith.constant 0 : index
    %c0_16 = arith.constant 0 : index
    %33 = vector.load %arg4[%c0_14, %c0_15, %c0_16] : memref<2x64x1xf32, #tpu.memory_space<vmem>>, vector<1x64x1xf32>
    %34 = vector.shape_cast %33 : vector<1x64x1xf32> to vector<64x1xf32>
    %35 = vector.shape_cast %32 : vector<64x1xf32> to vector<1x64x1xf32>
    tpu.vector_store %arg4[%c0_14, %c0_15, %c0_16], %35 {strides = array<i32>} : memref<2x64x1xf32, #tpu.memory_space<vmem>>, vector<1x64x1xf32>,
    %c1_17 = arith.constant 1 : index
    %c0_18 = arith.constant 0 : index
    %c0_19 = arith.constant 0 : index
    %36 = vector.load %arg4[%c1_17, %c0_18, %c0_19] : memref<2x64x1xf32, #tpu.memory_space<vmem>>, vector<1x64x1xf32>
    %37 = vector.shape_cast %36 : vector<1x64x1xf32> to vector<64x1xf32>
    %38 = vector.shape_cast %32 : vector<64x1xf32> to vector<1x64x1xf32>
    tpu.vector_store %arg4[%c1_17, %c0_18, %c0_19], %38 {strides = array<i32>} : memref<2x64x1xf32, #tpu.memory_space<vmem>>, vector<1x64x1xf32>,
    return
  }
  func.func @transform_0(%arg0: i32) -> (i32, i32) {
    %c0_i32 = arith.constant 0 : i32
    %c0_i32_0 = arith.constant 0 : i32
    return %arg0, %c0_i32 : i32, i32
  }
  func.func @transform_1(%arg0: i32) -> (i32, i32) {
    %c0_i32 = arith.constant 0 : i32
    %c0_i32_0 = arith.constant 0 : i32
    return %arg0, %c0_i32 : i32, i32
  }
  func.func @transform_2(%arg0: i32) -> (i32, i32, i32) {
    %c0_i32 = arith.constant 0 : i32
    %c0_i32_0 = arith.constant 0 : i32
    %c0_i32_1 = arith.constant 0 : i32
    return %c0_i32, %arg0, %c0_i32_0 : i32, i32, i32
  }
  func.func @transform_3(%arg0: i32) -> (i32, i32, i32) {
    %c0_i32 = arith.constant 0 : i32
    %c0_i32_0 = arith.constant 0 : i32
    %c0_i32_1 = arith.constant 0 : i32
    return %c0_i32, %arg0, %c0_i32_0 : i32, i32, i32
  }
}

</mosaic_0001>

<bundles_post_ra>
// kernel: tpu_custom_call.1
= control target key start
LH: loop header
LB: loop body
LE: loop exit
PB: predicated region body
PF: predicated region fallthrough
CT: control target
= control target key end

     0   :  { %vm37_vm0 = vcmask 261120   ;;  %vm190_vm1 = vcmask 257024   ;;  %vm272_vm2 = vcmask 7168   ;;  %s708_s0 = inlined_call_operand.vmem [shape: f32[64,32], index: 0, kind: input, shape index: {}]   ;;  %s709_s1 = inlined_call_operand.vmem [shape: f32[64,32], index: 1, kind: input, shape index: {}]   ;;  %s710_s2 = inlined_call_operand.vmem [shape: bf16[2,64,32], index: 2, kind: output, shape index: {0}]   ;;  %s711_s3 = inlined_call_operand.vmem [shape: f32[2,64,1], index: 3, kind: output, shape index: {1}]  }
   0x1   :  { %v401_v0 = vld [vmem:[%s708_s0 + $0x10] sm:$0xff]  ;;  %v406_v1 = vld [vmem:[%s708_s0] sm:$0xff]  ;;  %v411_v2 = vld [vmem:[%s708_s0 + $0x18] sm:$0xff] }
   0x2   :  { %v31_v3 = vmul.f32 %v401_v0, %v401_v0  ;;  %v29_v4 = vmul.f32 %v406_v1, %v406_v1  ;;  %v32_v5 = vmul.f32 %v411_v2, %v411_v2  ;;  %v422_v6 = vld [vmem:[%s708_s0 + $0x8] sm:$0xff]  ;;  %v434_v9 = vld [vmem:[%s708_s0 + $0x20] sm:$0xff]  ;;  %v447_v16 = vld [vmem:[%s708_s0 + $0x38] sm:$0xff] }
   0x3   :  { %v30_v7 = vmul.f32 %v422_v6, %v422_v6  ;;  %v429_v8 = vld [vmem:[%s708_s0 + $0x28] sm:$0xff]  ;;  %v33_v15 = vmul.f32 %v434_v9, %v434_v9  ;;  %v452_v17 = vld [vmem:[%s708_s0 + $0x30] sm:$0xff]  ;;  %v36_v20 = vmul.f32 %v447_v16, %v447_v16  ;;  %v468_v23 = vld [vmem:[%s709_s1] sm:$0xff] }
   0x4   :  { %v44_v10 = vsel %vm37_vm0, %v31_v3, 0.0  ;;  %v38_v11 = vsel %vm37_vm0, %v29_v4, 0.0  ;;  %v47_v12 = vsel %vm37_vm0, %v32_v5, 0.0  ;;  %v34_v14 = vmul.f32 %v429_v8, %v429_v8  ;;  %v463_v22 = vld [vmem:[%s709_s1 + $0x8] sm:$0xff]  ;;  %v479_v28 = vld [vmem:[%s709_s1 + $0x18] sm:$0xff]  ;;  %v484_v29 = vld [vmem:[%s709_s1 + $0x10] sm:$0xff] }
   0x5   :  { %45 = vadd.xlane.f32.xlu1 %v44_v10  ;;  %39 = vadd.xlane.f32.xlu0 %v38_v11  ;;  %v41_v13 = vsel %vm37_vm0, %v30_v7, 0.0  ;;  %v50_v19 = vsel %vm37_vm0, %v33_v15, 0.0  ;;  %v35_v21 = vmul.f32 %v452_v17, %v452_v17  ;;  %v59_v24 = vsel %vm37_vm0, %v36_v20, 0.0  ;;  %v495_v34 = vld [vmem:[%s709_s1 + $0x28] sm:$0xff]  ;;  %v500_v35 = vld [vmem:[%s709_s1 + $0x20] sm:$0xff]  ;;  %v511_v40 = vld [vmem:[%s709_s1 + $0x38] sm:$0xff] }
   0x6   :  { %v53_v18 = vsel %vm37_vm0, %v34_v14, 0.0  ;;  %v95_v26 = vmul.f32 %v463_v22, %v463_v22  ;;  %v94_v27 = vmul.f32 %v468_v23, %v468_v23  ;;  %v97_v32 = vmul.f32 %v479_v28, %v479_v28  ;;  %v516_v41 = vld [vmem:[%s709_s1 + $0x30] sm:$0xff] }
   0x7   :  { %v56_v25 = vsel %vm37_vm0, %v35_v21, 0.0  ;;  %v96_v33 = vmul.f32 %v484_v29, %v484_v29  ;;  %v99_v38 = vmul.f32 %v495_v34, %v495_v34  ;;  %v98_v39 = vmul.f32 %v500_v35, %v500_v35 }
   0x8   :  { %v105_v30 = vsel %vm37_vm0, %v95_v26, 0.0  ;;  %v102_v31 = vsel %vm37_vm0, %v94_v27, 0.0  ;;  %v111_v36 = vsel %vm37_vm0, %v97_v32, 0.0  ;;  %v101_v44 = vmul.f32 %v511_v40, %v511_v40 }
   0x9   :  { %48 = vadd.xlane.f32.xlu1 %v47_v12  ;;  %42 = vadd.xlane.f32.xlu0 %v41_v13  ;;  %v108_v37 = vsel %vm37_vm0, %v96_v33, 0.0  ;;  %v117_v42 = vsel %vm37_vm0, %v99_v38, 0.0  ;;  %v114_v43 = vsel %vm37_vm0, %v98_v39, 0.0  ;;  %v100_v45 = vmul.f32 %v516_v41, %v516_v41 }
   0xa   :  { %v123_v46 = vsel %vm37_vm0, %v101_v44, 0.0 }
   0xb   :  { %v120_v47 = vsel %vm37_vm0, %v100_v45, 0.0 }
   0xd   :  { %54 = vadd.xlane.f32.xlu1 %v53_v18  ;;  %51 = vadd.xlane.f32.xlu0 %v50_v19 }
  0x11   :  { %60 = vadd.xlane.f32.xlu1 %v59_v24  ;;  %57 = vadd.xlane.f32.xlu0 %v56_v25 }
  0x15   :  { %106 = vadd.xlane.f32.xlu1 %v105_v30  ;;  %103 = vadd.xlane.f32.xlu0 %v102_v31 }
  0x19   :  { %112 = vadd.xlane.f32.xlu1 %v111_v36  ;;  %109 = vadd.xlane.f32.xlu0 %v108_v37 }
  0x1d   :  { %118 = vadd.xlane.f32.xlu1 %v117_v42  ;;  %115 = vadd.xlane.f32.xlu0 %v114_v43 }
  0x21   :  { %124 = vadd.xlane.f32.xlu1 %v123_v46  ;;  %121 = vadd.xlane.f32.xlu0 %v120_v47 }
  0x92   :  { %v46_v48 = vpop.xlane.xlu1 %45  ;;  %v40_v49 = vpop.xlane.xlu0 %39 }
  0x93   :  { %v64_v50 = vmax.f32 %v46_v48, 1e-16  ;;  %v62_v51 = vmax.f32 %v40_v49, 1e-16 }
  0x95   :  { %346 = vrsqrt.f32 %v64_v50 }
  0x96   :  { %348 = vrsqrt.f32 %v62_v51  ;;  %v49_v52 = vpop.xlane.xlu1 %48  ;;  %v43_v53 = vpop.xlane.xlu0 %42 }
  0x97   :  { %v65_v54 = vmax.f32 %v49_v52, 1e-16  ;;  %v63_v55 = vmax.f32 %v43_v53, 1e-16 }
  0x99   :  { %350 = vrsqrt.f32 %v65_v54 }
  0x9a   :  { %352 = vrsqrt.f32 %v63_v55  ;;  %v55_v56 = vpop.xlane.xlu1 %54  ;;  %v52_v57 = vpop.xlane.xlu0 %51 }
  0x9b   :  { %v67_v58 = vmax.f32 %v55_v56, 1e-16  ;;  %v66_v59 = vmax.f32 %v52_v57, 1e-16 }
  0x9d   :  { %354 = vrsqrt.f32 %v67_v58 }
  0x9e   :  { %356 = vrsqrt.f32 %v66_v59  ;;  %v61_v60 = vpop.xlane.xlu1 %60  ;;  %v58_v61 = vpop.xlane.xlu0 %57 }
  0x9f   :  { %v347_v62 = vpop.eup %346  ;;  %v69_v63 = vmax.f32 %v61_v60, 1e-16  ;;  %v68_v3 = vmax.f32 %v58_v61, 1e-16 }
  0xa0   :  { %v349_v4 = vpop.eup %348  ;;  %v80_v5 = vmul.f32 1.4142135, %v347_v62 }
  0xa1   :  { %v78_v7 = vmul.f32 1.4142135, %v349_v4  ;;  %358 = vrsqrt.f32 %v69_v63 }
  0xa2   :  { %360 = vrsqrt.f32 %v68_v3  ;;  %v107_v10 = vpop.xlane.xlu1 %106  ;;  %v104_v11 = vpop.xlane.xlu0 %103  ;;  %v527_v12 = vmul.f32 %v80_v5, %v401_v0 }
  0xa3   :  { %v351_v13 = vpop.eup %350  ;;  %v127_v14 = vmax.f32 %v107_v10, 1e-16  ;;  %v126_v15 = vmax.f32 %v104_v11, 1e-16  ;;  %v530_v18 = vmul.f32 %v78_v7, %v406_v1 }
  0xa4   :  { %v353_v19 = vpop.eup %352  ;;  %v81_v20 = vmul.f32 1.4142135, %v351_v13  ;;  %v332_v21 = vpack.c.bf16 %v527_v12, %v527_v12 }
  0xa5   :  { %v79_v24 = vmul.f32 1.4142135, %v353_v19  ;;  %362 = vrsqrt.f32 %v127_v14  ;;  %v330_v25 = vpack.c.bf16 %v530_v18, %v530_v18 }
  0xa6   :  { %364 = vrsqrt.f32 %v126_v15  ;;  %v113_v0 = vpop.xlane.xlu1 %112  ;;  %v110_v26 = vpop.xlane.xlu0 %109  ;;  %v537_v27 = vmul.f32 %v81_v20, %v411_v2  ;;  %193 = vst.msk [vmem:[%s710_s2 + $0x8] sm:$0xf] %vm190_vm1, %v332_v21 }
  0xa7   :  { %v355_v1 = vpop.eup %354  ;;  %v129_v30 = vmax.f32 %v113_v0, 1e-16  ;;  %v128_v31 = vmax.f32 %v110_v26, 1e-16  ;;  %v87_v32 = vmul.f32 %v79_v24, %v422_v6  ;;  %191 = vst.msk [vmem:[%s710_s2] sm:$0xf] %vm190_vm1, %v330_v25 }
  0xa8   :  { %v357_v33 = vpop.eup %356  ;;  %v83_v36 = vmul.f32 1.4142135, %v355_v1  ;;  %v333_v2 = vpack.c.bf16 %v537_v27, %v537_v27 }
  0xa9   :  { %v82_v37 = vmul.f32 1.4142135, %v357_v33  ;;  %366 = vrsqrt.f32 %v129_v30  ;;  %v331_v38 = vpack.c.bf16 %v87_v32, %v87_v32 }
  0xaa   :  { %368 = vrsqrt.f32 %v128_v31  ;;  %v119_v39 = vpop.xlane.xlu1 %118  ;;  %v116_v42 = vpop.xlane.xlu0 %115  ;;  %194 = vst.msk [vmem:[%s710_s2 + $0xc] sm:$0xf] %vm190_vm1, %v333_v2  ;;  %v555_v6 = vmul.f32 %v83_v36, %v429_v8 }
  0xab   :  { %v359_v43 = vpop.eup %358  ;;  %v131_v44 = vmax.f32 %v119_v39, 1e-16  ;;  %v130_v45 = vmax.f32 %v116_v42, 1e-16  ;;  %192 = vst.msk [vmem:[%s710_s2 + $0x4] sm:$0xf] %vm190_vm1, %v331_v38  ;;  %v562_v46 = vmul.f32 %v82_v37, %v434_v9 }
  0xac   :  { %v361_v47 = vpop.eup %360  ;;  %v85_v48 = vmul.f32 1.4142135, %v359_v43  ;;  %v335_v49 = vpack.c.bf16 %v555_v6, %v555_v6 }
  0xad   :  { %v84_v50 = vmul.f32 1.4142135, %v361_v47  ;;  %370 = vrsqrt.f32 %v131_v44  ;;  %v334_v8 = vpack.c.bf16 %v562_v46, %v562_v46 }
  0xae   :  { %372 = vrsqrt.f32 %v130_v45  ;;  %v125_v51 = vpop.xlane.xlu1 %124  ;;  %v122_v52 = vpop.xlane.xlu0 %121  ;;  %196 = vst.msk [vmem:[%s710_s2 + $0x14] sm:$0xf] %vm190_vm1, %v335_v49  ;;  %v573_v9 = vmul.f32 %v85_v48, %v447_v16 }
  0xaf   :  { %v363_v53 = vpop.eup %362  ;;  %v133_v54 = vmax.f32 %v125_v51, 1e-16  ;;  %v132_v55 = vmax.f32 %v122_v52, 1e-16  ;;  %195 = vst.msk [vmem:[%s710_s2 + $0x10] sm:$0xf] %vm190_vm1, %v334_v8  ;;  %v92_v56 = vmul.f32 %v84_v50, %v452_v17 }
  0xb0   :  { %v365_v57 = vpop.eup %364  ;;  %v143_v58 = vmul.f32 1.4142135, %v363_v53  ;;  %v337_v59 = vpack.c.bf16 %v573_v9, %v573_v9 }
  0xb1   :  { %v142_v60 = vmul.f32 1.4142135, %v365_v57  ;;  %374 = vrsqrt.f32 %v133_v54  ;;  %v336_v61 = vpack.c.bf16 %v92_v56, %v92_v56 }
  0xb2   :  { %376 = vrsqrt.f32 %v132_v55  ;;  %v151_v16 = vmul.f32 %v143_v58, %v463_v22  ;;  %198 = vst.msk [vmem:[%s710_s2 + $0x1c] sm:$0xf] %vm190_vm1, %v337_v59 }
  0xb3   :  { %v367_v62 = vpop.eup %366  ;;  %v150_v63 = vmul.f32 %v142_v60, %v468_v23  ;;  %197 = vst.msk [vmem:[%s710_s2 + $0x18] sm:$0xf] %vm190_vm1, %v336_v61 }
  0xb4   :  { %v369_v17 = vpop.eup %368  ;;  %v145_v3 = vmul.f32 1.4142135, %v367_v62  ;;  %v339_v4 = vpack.c.bf16 %v151_v16, %v151_v16  ;;  %v241_v5 = vmul.f32 %v151_v16, %v87_v32 }
  0xb5   :  { %v144_v7 = vmul.f32 1.4142135, %v369_v17  ;;  %v240_v22 = vmul.f32 %v150_v63, %v530_v18  ;;  %v338_v10 = vpack.c.bf16 %v150_v63, %v150_v63 }
  0xb6   :  { %315 = vst.msk [vmem:[%s710_s2 + $0x24] sm:$0xf] %vm190_vm1, %v339_v4  ;;  %v251_v23 = vsel %vm37_vm0, %v241_v5, 0.0  ;;  %v153_v11 = vmul.f32 %v145_v3, %v479_v28 }
  0xb7   :  { %v371_v13 = vpop.eup %370  ;;  %252 = vadd.xlane.f32.xlu1 %v251_v23  ;;  %v248_v14 = vsel %vm37_vm0, %v240_v22, 0.0  ;;  %314 = vst.msk [vmem:[%s710_s2 + $0x20] sm:$0xf] %vm190_vm1, %v338_v10  ;;  %v152_v15 = vmul.f32 %v144_v7, %v484_v29 }
  0xb8   :  { %v373_v18 = vpop.eup %372  ;;  %v147_v19 = vmul.f32 1.4142135, %v371_v13  ;;  %249 = vadd.xlane.f32.xlu0 %v248_v14  ;;  %v341_v20 = vpack.c.bf16 %v153_v11, %v153_v11  ;;  %v243_v21 = vmul.f32 %v153_v11, %v537_v27 }
  0xb9   :  { %v146_v24 = vmul.f32 1.4142135, %v373_v18  ;;  %v242_v28 = vmul.f32 %v152_v15, %v527_v12  ;;  %v340_v25 = vpack.c.bf16 %v152_v15, %v152_v15 }
  0xba   :  { %317 = vst.msk [vmem:[%s710_s2 + $0x2c] sm:$0xf] %vm190_vm1, %v341_v20  ;;  %v257_v0 = vsel %vm37_vm0, %v243_v21, 0.0  ;;  %v155_v26 = vmul.f32 %v147_v19, %v495_v34 }
  0xbb   :  { %v375_v29 = vpop.eup %374  ;;  %258 = vadd.xlane.f32.xlu1 %v257_v0  ;;  %v254_v1 = vsel %vm37_vm0, %v242_v28, 0.0  ;;  %316 = vst.msk [vmem:[%s710_s2 + $0x28] sm:$0xf] %vm190_vm1, %v340_v25  ;;  %v154_v12 = vmul.f32 %v146_v24, %v500_v35 }
  0xbc   :  { %v377_v27 = vpop.eup %376  ;;  %v149_v30 = vmul.f32 1.4142135, %v375_v29  ;;  %255 = vadd.xlane.f32.xlu0 %v254_v1  ;;  %v343_v31 = vpack.c.bf16 %v155_v26, %v155_v26  ;;  %v245_v32 = vmul.f32 %v155_v26, %v555_v6 }
  0xbd   :  { %v148_v33 = vmul.f32 1.4142135, %v377_v27  ;;  %v244_v34 = vmul.f32 %v154_v12, %v562_v46  ;;  %v342_v36 = vpack.c.bf16 %v154_v12, %v154_v12 }
  0xbe   :  { %319 = vst.msk [vmem:[%s710_s2 + $0x34] sm:$0xf] %vm190_vm1, %v343_v31  ;;  %v263_v2 = vsel %vm37_vm0, %v245_v32, 0.0  ;;  %v157_v37 = vmul.f32 %v149_v30, %v511_v40 }
  0xbf   :  { %264 = vadd.xlane.f32.xlu1 %v263_v2  ;;  %v260_v35 = vsel %vm37_vm0, %v244_v34, 0.0  ;;  %318 = vst.msk [vmem:[%s710_s2 + $0x30] sm:$0xf] %vm190_vm1, %v342_v36  ;;  %v156_v38 = vmul.f32 %v148_v33, %v516_v41 }
  0xc0   :  { %261 = vadd.xlane.f32.xlu0 %v260_v35  ;;  %v345_v39 = vpack.c.bf16 %v157_v37, %v157_v37  ;;  %v247_v42 = vmul.f32 %v157_v37, %v573_v9 }
  0xc1   :  { %v246_v6 = vmul.f32 %v156_v38, %v92_v56  ;;  %v344_v43 = vpack.c.bf16 %v156_v38, %v156_v38 }
  0xc2   :  { %321 = vst.msk [vmem:[%s710_s2 + $0x3c] sm:$0xf] %vm190_vm1, %v345_v39  ;;  %v269_v40 = vsel %vm37_vm0, %v247_v42, 0.0 }
  0xc3   :  { %270 = vadd.xlane.f32.xlu1 %v269_v40  ;;  %v266_v44 = vsel %vm37_vm0, %v246_v6, 0.0  ;;  %320 = vst.msk [vmem:[%s710_s2 + $0x38] sm:$0xf] %vm190_vm1, %v344_v43 }
  0xc4   :  { %267 = vadd.xlane.f32.xlu0 %v266_v44 }
 0x144   :  { %v253_v41 = vpop.xlane.xlu1 %252 }
 0x145   :  { %274 = vst.msk [vmem:[%s711_s3 + $0x8] sm:$0xff] %vm272_vm2, %v253_v41  ;;  %323 = vst.msk [vmem:[%s711_s3 + $0x48] sm:$0xff] %vm272_vm2, %v253_v41  ;;  %v250_v45 = vpop.xlane.xlu0 %249 }
 0x146   :  { %273 = vst.msk [vmem:[%s711_s3] sm:$0xff] %vm272_vm2, %v250_v45  ;;  %322 = vst.msk [vmem:[%s711_s3 + $0x40] sm:$0xff] %vm272_vm2, %v250_v45 }
 0x148   :  { %v259_v46 = vpop.xlane.xlu1 %258 }
 0x149   :  { %276 = vst.msk [vmem:[%s711_s3 + $0x18] sm:$0xff] %vm272_vm2, %v259_v46  ;;  %325 = vst.msk [vmem:[%s711_s3 + $0x58] sm:$0xff] %vm272_vm2, %v259_v46  ;;  %v256_v47 = vpop.xlane.xlu0 %255 }
 0x14a   :  { %275 = vst.msk [vmem:[%s711_s3 + $0x10] sm:$0xff] %vm272_vm2, %v256_v47  ;;  %324 = vst.msk [vmem:[%s711_s3 + $0x50] sm:$0xff] %vm272_vm2, %v256_v47 }
 0x14c   :  { %v265_v48 = vpop.xlane.xlu1 %264 }
 0x14d   :  { %278 = vst.msk [vmem:[%s711_s3 + $0x28] sm:$0xff] %vm272_vm2, %v265_v48  ;;  %327 = vst.msk [vmem:[%s711_s3 + $0x68] sm:$0xff] %vm272_vm2, %v265_v48  ;;  %v262_v49 = vpop.xlane.xlu0 %261 }
 0x14e   :  { %277 = vst.msk [vmem:[%s711_s3 + $0x20] sm:$0xff] %vm272_vm2, %v262_v49  ;;  %326 = vst.msk [vmem:[%s711_s3 + $0x60] sm:$0xff] %vm272_vm2, %v262_v49 }
 0x150   :  { %v271_v50 = vpop.xlane.xlu1 %270 }
 0x151   :  { %280 = vst.msk [vmem:[%s711_s3 + $0x38] sm:$0xff] %vm272_vm2, %v271_v50  ;;  %329 = vst.msk [vmem:[%s711_s3 + $0x78] sm:$0xff] %vm272_vm2, %v271_v50  ;;  %v268_v8 = vpop.xlane.xlu0 %267 }
 0x152   :  { %279 = vst.msk [vmem:[%s711_s3 + $0x30] sm:$0xff] %vm272_vm2, %v268_v8  ;;  %328 = vst.msk [vmem:[%s711_s3 + $0x70] sm:$0xff] %vm272_vm2, %v268_v8 }

</bundles_post_ra>
